<compile_context>
chip_gen: v6e
topology: v6e:2x2x1
jax: 0.10.0
libtpu: 0.0.40
codegen_flags: <defaults>
</compile_context>

<pallas_src>
import jax
import jax.numpy as jnp
from jax.experimental import pallas as pl
from jax.experimental.pallas import tpu as pltpu


def _round_up(x, m):
    return ((x + m - 1) // m) * m


def _pad2d(a, rows, cols):
    r, c = a.shape
    if r == rows and c == cols:
        return a
    return jnp.pad(a, ((0, rows - r), (0, cols - c)))


def _vmem_budget_bytes():
    """Generation-aware scoped-VMEM budget: physical capacity minus headroom."""
    try:
        cap = int(pltpu.get_tpu_info().vmem_capacity_bytes)
    except Exception:
        cap = 64 * 1024 * 1024  # conservative default: v7x per-TC VMEM
    # ~20% headroom for Mosaic internal scratch / semaphores:
    #   v7x (64 MiB)      -> ~51 MiB budget
    #   v5e/v6e (128 MiB) -> ~102 MiB budget
    return min(int(cap * 0.8), cap - 8 * 1024 * 1024)


def _make_kernel(compute_dtype, use_h_scratch):
    def kernel(x_ref, w0_ref, b0_ref, w1_ref, b1_ref, o_ref, *scratch):
        # Layer 0: Linear (+ Identity norm) + ReLU.  Cast x in-kernel so the
        # wrapper never re-materializes x in HBM; accumulate in f32.
        x = x_ref[...].astype(compute_dtype)
        h = jnp.dot(x, w0_ref[...], preferred_element_type=jnp.float32)
        h = jnp.maximum(h + b0_ref[...], 0.0)
        if use_h_scratch:
            # Large tiles: stage the activation through VMEM to bound regalloc
            # pressure; small tiles skip the vst+vld round-trip entirely.
            h_ref = scratch[0]
            h_ref[...] = h.astype(compute_dtype)
            h = h_ref[...]
        else:
            h = h.astype(compute_dtype)
        # Layer 1: Linear (+ Identity norm) + ReLU (with_final_activation=True).
        y = jnp.dot(h, w1_ref[...], preferred_element_type=jnp.float32)
        y = jnp.maximum(y + b1_ref[...], 0.0)
        o_ref[...] = y.astype(o_ref.dtype)

    return kernel


def _pick_tile_m(M, per_row_bytes, resident_bytes, budget):
    """Largest row tile that fits the VMEM budget; prefer an even grid (v7x)."""
    if M <= 512:
        return M, 1  # single tile; block == full array dim is always legal
    fitting = []
    for cand in (2048, 1024, 512, 256, 128):
        if cand >= M:
            continue
        if resident_bytes + cand * per_row_bytes > budget:
            continue
        fitting.append(cand)
    if not fitting:
        # TODO(synk): weights do not fit VMEM even single-buffered at a 128-row
        # tile; needs a K-reduction grid axis (f32 accumulator + pl.when
        # init/finalize) instead of fully resident weights.
        return 128, pl.cdiv(M, 128)
    tile = fitting[0]
    if pl.cdiv(M, tile) % 2 == 1:
        # v7x megacore: prefer an even grid so both TensorCores get equal work,
        # but don't drop below 512-row tiles for it.
        for cand in fitting:
            if cand >= 512 and pl.cdiv(M, cand) % 2 == 0:
                tile = cand
                break
    return tile, pl.cdiv(M, tile)


def mlp_pallas(x, w0, b0, w1, b1, *, compute_dtype=None, out_dtype=None,
               tile_m=None):
    """Pallas MLP forward: relu(relu(x @ w0 + b0) @ w1 + b1).

    x: [M, nin]; w0: [nin, nin]; b0: [nin]; w1: [nin, nout]; b1: [nout].
    compute_dtype: matmul operand dtype.  Defaults to x.dtype (no silent
      down-cast); pass jnp.bfloat16 explicitly to opt into MXU-native bf16
      operands.  Accumulation is always f32.
    out_dtype: output dtype (defaults to x.dtype).
    """
    M, nin = x.shape
    nout = w1.shape[1]
    if compute_dtype is None:
        compute_dtype = x.dtype
    if out_dtype is None:
        out_dtype = x.dtype

    # Lane-dense padding of the feature dims only (unmasked vst, full MXU
    # tiles).  Rows of x are NOT padded: a ragged last row-tile is handled by
    # the pipeline's boundary masking, so there is no extra HBM pass over x.
    nin_p = _round_up(nin, 128)
    nout_p = _round_up(nout, 128)

    x_p = x if nin_p == nin else jnp.pad(x, ((0, 0), (0, nin_p - nin)))
    # Weights / biases are small and read once: pre-cast / pad in the wrapper.
    w0_p = _pad2d(w0, nin_p, nin_p).astype(compute_dtype)
    w1_p = _pad2d(w1, nin_p, nout_p).astype(compute_dtype)
    b0_p = _pad2d(b0.reshape(1, nin), 1, nin_p).astype(jnp.float32)
    b1_p = _pad2d(b1.reshape(1, nout), 1, nout_p).astype(jnp.float32)

    x_bytes = jnp.dtype(x.dtype).itemsize
    c_bytes = jnp.dtype(compute_dtype).itemsize
    o_bytes = jnp.dtype(out_dtype).itemsize

    # Resident operands (single-buffered via pl.Buffered(1)).
    resident_bytes = ((nin_p * nin_p + nin_p * nout_p) * c_bytes
                      + (nin_p + nout_p) * 4)
    # Per-row VMEM: double-buffered x and out tiles + (possible) h scratch.
    per_row_bytes = 2 * nin_p * x_bytes + 2 * nout_p * o_bytes + nin_p * c_bytes

    budget = _vmem_budget_bytes()
    if tile_m is None:
        tile_m, grid_m = _pick_tile_m(M, per_row_bytes, resident_bytes, budget)
    else:
        grid_m = pl.cdiv(M, tile_m)

    # Keep small activations in registers; stage big ones through VMEM.
    use_h_scratch = tile_m * nin_p * c_bytes > 128 * 1024
    scratch_shapes = (
        [pltpu.VMEM((tile_m, nin_p), compute_dtype)] if use_h_scratch else []
    )

    est_bytes = resident_bytes + tile_m * per_row_bytes
    vmem_limit = min(budget,
                     max(32 * 1024 * 1024, int(est_bytes * 5 // 4) + (2 << 20)))

    flops = 2 * M * nin_p * (nin_p + nout_p)
    bytes_accessed = (x_p.size * x_bytes + w0_p.size * c_bytes
                      + w1_p.size * c_bytes + (nin_p + nout_p) * 4
                      + M * nout_p * o_bytes)
    cost = pl.CostEstimate(flops=flops, transcendentals=0,
                           bytes_accessed=bytes_accessed)

    kernel = _make_kernel(compute_dtype, use_h_scratch)

    def build(single_buffer_weights):
        w_mode = pl.Buffered(1) if single_buffer_weights else None
        in_specs = [
            pl.BlockSpec((tile_m, nin_p), lambda i: (i, 0)),      # x row tile
            pl.BlockSpec((nin_p, nin_p), lambda i: (0, 0),
                         pipeline_mode=w_mode),                   # W0 (resident)
            pl.BlockSpec((1, nin_p), lambda i: (0, 0),
                         pipeline_mode=w_mode),                   # b0
            pl.BlockSpec((nin_p, nout_p), lambda i: (0, 0),
                         pipeline_mode=w_mode),                   # W1 (resident)
            pl.BlockSpec((1, nout_p), lambda i: (0, 0),
                         pipeline_mode=w_mode),                   # b1
        ]
        return pl.pallas_call(
            kernel,
            out_shape=jax.ShapeDtypeStruct((M, nout_p), out_dtype),
            grid_spec=pltpu.PrefetchScalarGridSpec(
                num_scalar_prefetch=0,
                grid=(grid_m,),
                in_specs=in_specs,
                out_specs=pl.BlockSpec((tile_m, nout_p), lambda i: (i, 0)),
                scratch_shapes=scratch_shapes,
            ),
            compiler_params=pltpu.CompilerParams(
                dimension_semantics=("parallel",),
                vmem_limit_bytes=vmem_limit,
            ),
            cost_estimate=cost,
        )

    try:
        out_p = build(single_buffer_weights=True)(x_p, w0_p, b0_p, w1_p, b1_p)
    except Exception:
        # Fallback for jax versions where pipeline_mode=pl.Buffered(1) is not
        # accepted by the Mosaic pipeliner (double-buffered resident weights).
        out_p = build(single_buffer_weights=False)(x_p, w0_p, b0_p, w1_p, b1_p)

    # No row padding was added; only slice off feature-dim padding (fast path
    # when nout is already lane-aligned).
    return out_p if nout_p == nout else out_p[:, :nout]


def init_params(key, nin, nout):
    """Deterministic init mimicking nn.Linear (uniform(-1/sqrt(fan_in), ...))."""
    k0, k1, k2, k3 = jax.random.split(key, 4)
    lim = 1.0 / jnp.sqrt(jnp.float32(nin))
    # stored as [in, out] (transposed relative to torch's [out, in])
    w0 = jax.random.uniform(k0, (nin, nin), jnp.float32, -lim, lim)
    b0 = jax.random.uniform(k1, (nin,), jnp.float32, -lim, lim)
    w1 = jax.random.uniform(k2, (nin, nout), jnp.float32, -lim, lim)
    b1 = jax.random.uniform(k3, (nout,), jnp.float32, -lim, lim)
    return w0, b0, w1, b1


def mlp_reference_f32(x, w0, b0, w1, b1):
    h = jnp.maximum(jnp.dot(x, w0, precision="highest") + b0, 0.0)
    return jnp.maximum(jnp.dot(h, w1, precision="highest") + b1, 0.0)


def mlp_reference_bf16(x, w0, b0, w1, b1):
    # Same numerics as the opt-in bf16 path: bf16 operands, f32 accumulation.
    bf = jnp.bfloat16
    h = jnp.dot(x.astype(bf), w0.astype(bf), preferred_element_type=jnp.float32)
    h = jnp.maximum(h + b0, 0.0)
    y = jnp.dot(h.astype(bf), w1.astype(bf), preferred_element_type=jnp.float32)
    return jnp.maximum(y + b1, 0.0)


if __name__ == "__main__":
    # Small shapes consistent with the module: MLP(nin=32, nout=32) applied to
    # 16 feature rows.
    M, nin, nout = 16, 32, 32

    key = jax.random.PRNGKey(0)
    kx, kp = jax.random.split(key)
    x = jax.random.normal(kx, (M, nin), jnp.float32)
    w0, b0, w1, b1 = init_params(kp, nin, nout)

    ref_f32 = mlp_reference_f32(x, w0, b0, w1, b1)

    # Default path: compute dtype == x.dtype (no silent down-cast).  Tolerance
    # covers MXU default-precision f32 matmul passes.
    out_f32 = jax.block_until_ready(mlp_pallas(x, w0, b0, w1, b1))
    assert out_f32.shape == (M, nout)
    assert jnp.allclose(out_f32, ref_f32, atol=5e-2, rtol=5e-2), "f32 mismatch"

    # Opt-in fast path: bf16 MXU operands, f32 accumulation.
    out_bf16 = jax.block_until_ready(
        mlp_pallas(x, w0, b0, w1, b1, compute_dtype=jnp.bfloat16))
    ref_bf16 = mlp_reference_bf16(x, w0, b0, w1, b1)
    assert out_bf16.shape == (M, nout)
    assert jnp.allclose(out_bf16, ref_bf16, atol=1e-3, rtol=1e-3), "bf16 mismatch"
    assert jnp.allclose(out_bf16, ref_f32, atol=5e-2, rtol=5e-2), "bf16 vs f32"

    print("KERNEL_OK")
</pallas_src>

<mosaic_0001>
module attributes {stable_mosaic.version = 11 : i64} {
  func.func @kernel(%arg0: i32, %arg1: memref<16x128xf32, #tpu.memory_space<vmem>>, %arg2: memref<128x128xf32, #tpu.memory_space<vmem>>, %arg3: memref<1x128xf32, #tpu.memory_space<vmem>>, %arg4: memref<128x128xf32, #tpu.memory_space<vmem>>, %arg5: memref<1x128xf32, #tpu.memory_space<vmem>>, %arg6: memref<16x128xf32, #tpu.memory_space<vmem>>) attributes {dimension_semantics = [#tpu.dimension_semantics<parallel>], iteration_bounds = array<i64: 1>, scalar_prefetch = 0 : i64, scratch_operands = 0 : i64, tpu.core_type = #tpu.core_type<tc>, window_params = [{transform_indices = @transform_0, window_bounds = array<i64: 16, 128>}, {pipeline_mode = #tpu.pipeline_mode<synchronous>, transform_indices = @transform_1, window_bounds = array<i64: 128, 128>}, {pipeline_mode = #tpu.pipeline_mode<synchronous>, transform_indices = @transform_2, window_bounds = array<i64: 1, 128>}, {pipeline_mode = #tpu.pipeline_mode<synchronous>, transform_indices = @transform_3, window_bounds = array<i64: 128, 128>}, {pipeline_mode = #tpu.pipeline_mode<synchronous>, transform_indices = @transform_4, window_bounds = array<i64: 1, 128>}, {transform_indices = @transform_5, window_bounds = array<i64: 16, 128>}]} {
    %c0 = arith.constant 0 : index
    %c0_0 = arith.constant 0 : index
    %0 = vector.load %arg1[%c0, %c0_0] : memref<16x128xf32, #tpu.memory_space<vmem>>, vector<16x128xf32>
    %c0_1 = arith.constant 0 : index
    %c0_2 = arith.constant 0 : index
    %1 = vector.load %arg2[%c0_1, %c0_2] : memref<128x128xf32, #tpu.memory_space<vmem>>, vector<128x128xf32>
    %cst = arith.constant dense<0.000000e+00> : vector<16x128xf32>
    %2 = tpu.matmul %0, %1, %cst {dimension_numbers = #tpu.dot_dimension_numbers<[1], [0], [0], [1], [0, 0, 1, 1], [], []>} : vector<16x128xf32>, vector<128x128xf32>, vector<16x128xf32> -> vector<16x128xf32>
    %c0_3 = arith.constant 0 : index
    %c0_4 = arith.constant 0 : index
    %3 = vector.load %arg3[%c0_3, %c0_4] : memref<1x128xf32, #tpu.memory_space<vmem>>, vector<1x128xf32>
    %4 = vector.broadcast %3 : vector<1x128xf32> to vector<16x128xf32>
    %5 = arith.addf %2, %4 : vector<16x128xf32>
    %cst_5 = arith.constant 0.000000e+00 : f32
    %6 = vector.broadcast %cst_5 : f32 to vector<16x128xf32>
    %7 = arith.maximumf %5, %6 : vector<16x128xf32>
    %c0_6 = arith.constant 0 : index
    %c0_7 = arith.constant 0 : index
    %8 = vector.load %arg4[%c0_6, %c0_7] : memref<128x128xf32, #tpu.memory_space<vmem>>, vector<128x128xf32>
    %cst_8 = arith.constant dense<0.000000e+00> : vector<16x128xf32>
    %9 = tpu.matmul %7, %8, %cst_8 {dimension_numbers = #tpu.dot_dimension_numbers<[1], [0], [0], [1], [0, 0, 1, 1], [], []>} : vector<16x128xf32>, vector<128x128xf32>, vector<16x128xf32> -> vector<16x128xf32>
    %c0_9 = arith.constant 0 : index
    %c0_10 = arith.constant 0 : index
    %10 = vector.load %arg5[%c0_9, %c0_10] : memref<1x128xf32, #tpu.memory_space<vmem>>, vector<1x128xf32>
    %11 = vector.broadcast %10 : vector<1x128xf32> to vector<16x128xf32>
    %12 = arith.addf %9, %11 : vector<16x128xf32>
    %cst_11 = arith.constant 0.000000e+00 : f32
    %13 = vector.broadcast %cst_11 : f32 to vector<16x128xf32>
    %14 = arith.maximumf %12, %13 : vector<16x128xf32>
    %c0_12 = arith.constant 0 : index
    %c0_13 = arith.constant 0 : index
    %15 = vector.load %arg6[%c0_12, %c0_13] : memref<16x128xf32, #tpu.memory_space<vmem>>, vector<16x128xf32>
    tpu.vector_store %arg6[%c0_12, %c0_13], %14 {strides = array<i32>} : memref<16x128xf32, #tpu.memory_space<vmem>>, vector<16x128xf32>,
    return
  }
  func.func @transform_0(%arg0: i32) -> (i32, i32) {
    %c0_i32 = arith.constant 0 : i32
    %c0_i32_0 = arith.constant 0 : i32
    return %arg0, %c0_i32 : i32, i32
  }
  func.func @transform_1(%arg0: i32) -> (i32, i32) {
    %c0_i32 = arith.constant 0 : i32
    %c0_i32_0 = arith.constant 0 : i32
    %c0_i32_1 = arith.constant 0 : i32
    return %c0_i32, %c0_i32_0 : i32, i32
  }
  func.func @transform_2(%arg0: i32) -> (i32, i32) {
    %c0_i32 = arith.constant 0 : i32
    %c0_i32_0 = arith.constant 0 : i32
    %c0_i32_1 = arith.constant 0 : i32
    return %c0_i32, %c0_i32_0 : i32, i32
  }
  func.func @transform_3(%arg0: i32) -> (i32, i32) {
    %c0_i32 = arith.constant 0 : i32
    %c0_i32_0 = arith.constant 0 : i32
    %c0_i32_1 = arith.constant 0 : i32
    return %c0_i32, %c0_i32_0 : i32, i32
  }
  func.func @transform_4(%arg0: i32) -> (i32, i32) {
    %c0_i32 = arith.constant 0 : i32
    %c0_i32_0 = arith.constant 0 : i32
    %c0_i32_1 = arith.constant 0 : i32
    return %c0_i32, %c0_i32_0 : i32, i32
  }
  func.func @transform_5(%arg0: i32) -> (i32, i32) {
    %c0_i32 = arith.constant 0 : i32
    %c0_i32_0 = arith.constant 0 : i32
    return %arg0, %c0_i32 : i32, i32
  }
}

module attributes {stable_mosaic.version = 11 : i64} {
  func.func @kernel(%arg0: i32, %arg1: memref<16x128xf32, #tpu.memory_space<vmem>>, %arg2: memref<128x128xf32, #tpu.memory_space<vmem>>, %arg3: memref<1x128xf32, #tpu.memory_space<vmem>>, %arg4: memref<128x128xf32, #tpu.memory_space<vmem>>, %arg5: memref<1x128xf32, #tpu.memory_space<vmem>>, %arg6: memref<16x128xf32, #tpu.memory_space<vmem>>) attributes {dimension_semantics = [#tpu.dimension_semantics<parallel>], iteration_bounds = array<i64: 1>, scalar_prefetch = 0 : i64, scratch_operands = 0 : i64, tpu.core_type = #tpu.core_type<tc>, window_params = [{transform_indices = @transform_0, window_bounds = array<i64: 16, 128>}, {pipeline_mode = #tpu.pipeline_mode<synchronous>, transform_indices = @transform_1, window_bounds = array<i64: 128, 128>}, {pipeline_mode = #tpu.pipeline_mode<synchronous>, transform_indices = @transform_2, window_bounds = array<i64: 1, 128>}, {pipeline_mode = #tpu.pipeline_mode<synchronous>, transform_indices = @transform_3, window_bounds = array<i64: 128, 128>}, {pipeline_mode = #tpu.pipeline_mode<synchronous>, transform_indices = @transform_4, window_bounds = array<i64: 1, 128>}, {transform_indices = @transform_5, window_bounds = array<i64: 16, 128>}]} {
    %c0 = arith.constant 0 : index
    %c0_0 = arith.constant 0 : index
    %0 = vector.load %arg1[%c0, %c0_0] : memref<16x128xf32, #tpu.memory_space<vmem>>, vector<16x128xf32>
    %c0_1 = arith.constant 0 : index
    %c0_2 = arith.constant 0 : index
    %1 = vector.load %arg2[%c0_1, %c0_2] : memref<128x128xf32, #tpu.memory_space<vmem>>, vector<128x128xf32>
    %cst = arith.constant dense<0.000000e+00> : vector<16x128xf32>
    %2 = tpu.matmul %0, %1, %cst {dimension_numbers = #tpu.dot_dimension_numbers<[1], [0], [0], [1], [0, 0, 1, 1], [], []>} : vector<16x128xf32>, vector<128x128xf32>, vector<16x128xf32> -> vector<16x128xf32>
    %c0_3 = arith.constant 0 : index
    %c0_4 = arith.constant 0 : index
    %3 = vector.load %arg3[%c0_3, %c0_4] : memref<1x128xf32, #tpu.memory_space<vmem>>, vector<1x128xf32>
    %4 = vector.broadcast %3 : vector<1x128xf32> to vector<16x128xf32>
    %5 = arith.addf %2, %4 : vector<16x128xf32>
    %cst_5 = arith.constant 0.000000e+00 : f32
    %6 = vector.broadcast %cst_5 : f32 to vector<16x128xf32>
    %7 = arith.maximumf %5, %6 : vector<16x128xf32>
    %c0_6 = arith.constant 0 : index
    %c0_7 = arith.constant 0 : index
    %8 = vector.load %arg4[%c0_6, %c0_7] : memref<128x128xf32, #tpu.memory_space<vmem>>, vector<128x128xf32>
    %cst_8 = arith.constant dense<0.000000e+00> : vector<16x128xf32>
    %9 = tpu.matmul %7, %8, %cst_8 {dimension_numbers = #tpu.dot_dimension_numbers<[1], [0], [0], [1], [0, 0, 1, 1], [], []>} : vector<16x128xf32>, vector<128x128xf32>, vector<16x128xf32> -> vector<16x128xf32>
    %c0_9 = arith.constant 0 : index
    %c0_10 = arith.constant 0 : index
    %10 = vector.load %arg5[%c0_9, %c0_10] : memref<1x128xf32, #tpu.memory_space<vmem>>, vector<1x128xf32>
    %11 = vector.broadcast %10 : vector<1x128xf32> to vector<16x128xf32>
    %12 = arith.addf %9, %11 : vector<16x128xf32>
    %cst_11 = arith.constant 0.000000e+00 : f32
    %13 = vector.broadcast %cst_11 : f32 to vector<16x128xf32>
    %14 = arith.maximumf %12, %13 : vector<16x128xf32>
    %c0_12 = arith.constant 0 : index
    %c0_13 = arith.constant 0 : index
    %15 = vector.load %arg6[%c0_12, %c0_13] : memref<16x128xf32, #tpu.memory_space<vmem>>, vector<16x128xf32>
    tpu.vector_store %arg6[%c0_12, %c0_13], %14 {strides = array<i32>} : memref<16x128xf32, #tpu.memory_space<vmem>>, vector<16x128xf32>,
    return
  }
  func.func @transform_0(%arg0: i32) -> (i32, i32) {
    %c0_i32 = arith.constant 0 : i32
    %c0_i32_0 = arith.constant 0 : i32
    return %arg0, %c0_i32 : i32, i32
  }
  func.func @transform_1(%arg0: i32) -> (i32, i32) {
    %c0_i32 = arith.constant 0 : i32
    %c0_i32_0 = arith.constant 0 : i32
    %c0_i32_1 = arith.constant 0 : i32
    return %c0_i32, %c0_i32_0 : i32, i32
  }
  func.func @transform_2(%arg0: i32) -> (i32, i32) {
    %c0_i32 = arith.constant 0 : i32
    %c0_i32_0 = arith.constant 0 : i32
    %c0_i32_1 = arith.constant 0 : i32
    return %c0_i32, %c0_i32_0 : i32, i32
  }
  func.func @transform_3(%arg0: i32) -> (i32, i32) {
    %c0_i32 = arith.constant 0 : i32
    %c0_i32_0 = arith.constant 0 : i32
    %c0_i32_1 = arith.constant 0 : i32
    return %c0_i32, %c0_i32_0 : i32, i32
  }
  func.func @transform_4(%arg0: i32) -> (i32, i32) {
    %c0_i32 = arith.constant 0 : i32
    %c0_i32_0 = arith.constant 0 : i32
    %c0_i32_1 = arith.constant 0 : i32
    return %c0_i32, %c0_i32_0 : i32, i32
  }
  func.func @transform_5(%arg0: i32) -> (i32, i32) {
    %c0_i32 = arith.constant 0 : i32
    %c0_i32_0 = arith.constant 0 : i32
    return %arg0, %c0_i32 : i32, i32
  }
}

</mosaic_0001>

<bundles_post_ra>
// kernel: tpu_custom_call.1
= control target key start
LH: loop header
LB: loop body
LE: loop exit
PB: predicated region body
PF: predicated region fallthrough
CT: control target
= control target key end

     0   :  { %10 = vsyncpa [#allocation3], 0  ;;  %s550_s0 = inlined_call_operand.hbm [shape: f32[16,128], index: 0, kind: input, shape index: {}]   ;;  %s551_s1 = inlined_call_operand.hbm [shape: f32[128,128], index: 1, kind: input, shape index: {}]   ;;  %s552_s2 = inlined_call_operand.vmem [shape: f32[1,128], index: 2, kind: input, shape index: {}]   ;;  %s553_s3 = inlined_call_operand.hbm [shape: f32[128,128], index: 3, kind: input, shape index: {}]   ;;  %s554_s4 = inlined_call_operand.vmem [shape: f32[1,128], index: 4, kind: input, shape index: {}]   ;;  %s555_s5 = inlined_call_operand.hbm [shape: f32[16,128], index: 5, kind: output, shape index: {}]  }
   0x1   :  { %11 = vsyncpa [#allocation6], 0 }
   0x2   :  { %12 = vsyncpa [#allocation4], 0  ;;  %s484_s18 = smov [#allocation5]   ;;  %s485_s20 = smov [#allocation2]  }
   0x3   :  { %s30_s19 = sshll.u32 %s484_s18, 4  ;;  %s18_s21 = sshll.u32 %s485_s20, 4  ;;  %s31_s19 = int_to_ptr.vmem [resolvable:$true] %s30_s19  ;;  %s19_s21 = int_to_ptr.vmem [resolvable:$true] %s18_s21 }
   0x4   :  { %s406_s22 = scalar_lea.vmem %s31_s19, 2048  ;;  %p411_p1 = scmp.lt.s32.totalorder %s31_s19, %s31_s19 }
   0x5   :  { %p407_p0 = scmp.ne.s32.totalorder %s31_s19, %s406_s22  ;;  %p412_p2 = scmp.lt.s32.totalorder %s406_s22, %s406_s22 }
   0x7   :  { %p413_p3 = por %p412_p2, %p411_p1 }
   0x9   :  { %p414_p4 = pnand %p413_p3, %p407_p0 }
   0xb   :  { %417 = shalt.err (!%p414_p4)
}
   0xc   :  { %s486_s23 = smov 128   ;;  %s487_s24 = smov 8  }
   0xd   :  { %36 = dma.hbm_to_vmem [thread:$0]  %s551_s1, 2048, %s31_s19, [#allocation6], %s486_s23, %s486_s23, %s487_s24  }
   0xe   :  { %s426_s27 = scalar_lea.vmem %s19_s21, 256  ;;  %p431_p6 = scmp.lt.s32.totalorder %s19_s21, %s19_s21 }
   0xf   :  { %p427_p5 = scmp.ne.s32.totalorder %s19_s21, %s426_s27  ;;  %p432_p7 = scmp.lt.s32.totalorder %s426_s27, %s426_s27 }
  0x11   :  { %p433_p8 = por %p432_p7, %p431_p6 }
  0x13   :  { %p434_p9 = pnand %p433_p8, %p427_p5 }
  0x15   :  { %437 = shalt.err (!%p434_p9)
}
  0x16   :  { %24 = dma.hbm_to_vmem [thread:$0]  %s550_s0, 256, %s19_s21, [#allocation3], %s486_s23, %s486_s23, %s487_s24  }
  0x17   :  { %s488_s30 = smov [#allocation7]  }
  0x18   :  { %s44_s6 = sshll.u32 %s488_s30, 4  ;;  %s45_s6 = int_to_ptr.vmem [resolvable:$true] %s44_s6 }
  0x19   :  { %s446_s7 = scalar_lea.vmem %s45_s6, 2048  ;;  %p451_p11 = scmp.lt.s32.totalorder %s45_s6, %s45_s6 }
  0x1a   :  { %p447_p10 = scmp.ne.s32.totalorder %s45_s6, %s446_s7  ;;  %p452_p12 = scmp.lt.s32.totalorder %s446_s7, %s446_s7 }
  0x1c   :  { %p453_p13 = por %p452_p12, %p451_p11 }
  0x1e   :  { %p454_p0 = pnand %p453_p13, %p447_p10 }
  0x20   :  { %457 = shalt.err (!%p454_p0)
}
  0x21   :  { %50 = dma.hbm_to_vmem [thread:$0]  %s553_s3, 2048, %s45_s6, [#allocation6], %s486_s23, %s486_s23, %s487_s24  }
  0x22   :  { %478 = dma.done.wait [#allocation3], 256  }
  0x23   :  { %479 = vsyncadd [#allocation3], 4294967040 }
  0x24   :  { %480 = dma.done.wait [#allocation6], 4096  }
  0x25   :  { %481 = vsyncadd [#allocation6], 4294963200  ;;  %v79_v0 = vld [vmem:[#allocation5 + $0x78] sm:$0xff]  ;;  %v78_v1 = vld [vmem:[#allocation5 + $0x70] sm:$0xff]  ;;  %s489_s11 = smov [#allocation8]  }
  0x26   :  { %322 = vmatprep.subr.mxu0 %v79_v0  ;;  %v77_v2 = vld [vmem:[#allocation5 + $0x68] sm:$0xff]  ;;  %v76_v3 = vld [vmem:[#allocation5 + $0x60] sm:$0xff]  ;;  %v62_v4 = vld [vmem:[#allocation2] sm:$0xff]  ;;  %s271_s12 = sshll.u32 %s489_s11, 4  ;;  %s272_s12 = int_to_ptr.vmem [resolvable:$true] %s271_s12 }
  0x27   :  { %323 = vmatpush3.msra.mxu0 %v79_v0  ;;  %v75_v5 = vld [vmem:[#allocation5 + $0x58] sm:$0xff]  ;;  %354 = vmatprep.mubr.f32.mxu0 %v62_v4  ;;  %v178_v7 = vld [vmem:[#allocation7 + $0x70] sm:$0xff]  ;;  %v177_v9 = vld [vmem:[#allocation7 + $0x68] sm:$0xff]  ;;  %p463_p2 = scmp.lt.s32.totalorder %s272_s12, %s272_s12 }
  0x28   :  { %324 = vmatprep.subr.mxu0 %v78_v1  ;;  %v179_v6 = vld [vmem:[#allocation7 + $0x78] sm:$0xff]  ;;  %v74_v8 = vld [vmem:[#allocation5 + $0x50] sm:$0xff]  ;;  %v73_v10 = vld [vmem:[#allocation5 + $0x48] sm:$0xff] }
  0x29   :  { %325 = vmatpush3.msra.mxu0 %v78_v1  ;;  %357 = vmatprep.subr.mxu1 %v179_v6  ;;  %v176_v11 = vld [vmem:[#allocation7 + $0x60] sm:$0xff]  ;;  %v175_v13 = vld [vmem:[#allocation7 + $0x58] sm:$0xff]  ;;  %v174_v15 = vld [vmem:[#allocation7 + $0x50] sm:$0xff] }
  0x2a   :  { %326 = vmatprep.subr.mxu0 %v77_v2  ;;  %358 = vmatpush3.msra.mxu1 %v179_v6  ;;  %v72_v12 = vld [vmem:[#allocation5 + $0x40] sm:$0xff]  ;;  %v71_v14 = vld [vmem:[#allocation5 + $0x38] sm:$0xff]  ;;  %v70_v16 = vld [vmem:[#allocation5 + $0x30] sm:$0xff] }
  0x2b   :  { %327 = vmatpush3.msra.mxu0 %v77_v2  ;;  %359 = vmatprep.subr.mxu1 %v178_v7  ;;  %v173_v17 = vld [vmem:[#allocation7 + $0x48] sm:$0xff]  ;;  %v172_v19 = vld [vmem:[#allocation7 + $0x40] sm:$0xff]  ;;  %v171_v21 = vld [vmem:[#allocation7 + $0x38] sm:$0xff] }
  0x2c   :  { %328 = vmatprep.subr.mxu0 %v76_v3  ;;  %360 = vmatpush3.msra.mxu1 %v178_v7  ;;  %v69_v18 = vld [vmem:[#allocation5 + $0x28] sm:$0xff]  ;;  %v68_v20 = vld [vmem:[#allocation5 + $0x20] sm:$0xff]  ;;  %v67_v22 = vld [vmem:[#allocation5 + $0x18] sm:$0xff] }
  0x2d   :  { %329 = vmatpush3.msra.mxu0 %v76_v3  ;;  %361 = vmatprep.subr.mxu1 %v177_v9  ;;  %v170_v23 = vld [vmem:[#allocation7 + $0x30] sm:$0xff]  ;;  %v169_v25 = vld [vmem:[#allocation7 + $0x28] sm:$0xff]  ;;  %v168_v27 = vld [vmem:[#allocation7 + $0x20] sm:$0xff] }
  0x2e   :  { %330 = vmatprep.subr.mxu0 %v75_v5  ;;  %362 = vmatpush3.msra.mxu1 %v177_v9  ;;  %v66_v24 = vld [vmem:[#allocation5 + $0x10] sm:$0xff]  ;;  %v65_v26 = vld [vmem:[#allocation5 + $0x8] sm:$0xff]  ;;  %v64_v28 = vld [vmem:[#allocation5] sm:$0xff] }
  0x2f   :  { %331 = vmatpush3.msra.mxu0 %v75_v5  ;;  %363 = vmatprep.subr.mxu1 %v176_v11  ;;  %v63_v29 = vld [vmem:[#allocation2 + $0x8] sm:$0xff]  ;;  %v166_v31 = vld [vmem:[#allocation7 + $0x10] sm:$0xff]  ;;  %v165_v32 = vld [vmem:[#allocation7 + $0x8] sm:$0xff] }
  0x30   :  { %332 = vmatprep.subr.mxu0 %v74_v8  ;;  %364 = vmatpush3.msra.mxu1 %v176_v11  ;;  %v167_v30 = vld [vmem:[#allocation7 + $0x18] sm:$0xff]  ;;  %v164_v33 = vld [vmem:[#allocation7] sm:$0xff]  ;;  %v284_v34 = vld [vmem:[%s552_s2] ss:$0 sm:$0xff]  ;;  %s458_s2 = scalar_lea.vmem %s272_s12, 256 }
  0x31   :  { %333 = vmatpush3.msra.mxu0 %v74_v8  ;;  %365 = vmatprep.subr.mxu1 %v175_v13  ;;  %v285_v41 = vld [vmem:[%s554_s4] ss:$0 sm:$0xff]  ;;  %p459_p1 = scmp.ne.s32.totalorder %s272_s12, %s458_s2  ;;  %p464_p3 = scmp.lt.s32.totalorder %s458_s2, %s458_s2 }
  0x32   :  { %334 = vmatprep.subr.mxu0 %v73_v10  ;;  %366 = vmatpush3.msra.mxu1 %v175_v13 }
  0x33   :  { %335 = vmatpush3.msra.mxu0 %v73_v10  ;;  %367 = vmatprep.subr.mxu1 %v174_v15  ;;  %p465_p4 = por %p464_p3, %p463_p2 }
  0x34   :  { %336 = vmatprep.subr.mxu0 %v72_v12  ;;  %368 = vmatpush3.msra.mxu1 %v174_v15 }
  0x35   :  { %337 = vmatpush3.msra.mxu0 %v72_v12  ;;  %369 = vmatprep.subr.mxu1 %v173_v17  ;;  %p466_p5 = pnand %p465_p4, %p459_p1 }
  0x36   :  { %338 = vmatprep.subr.mxu0 %v71_v14  ;;  %370 = vmatpush3.msra.mxu1 %v173_v17 }
  0x37   :  { %339 = vmatpush3.msra.mxu0 %v71_v14  ;;  %371 = vmatprep.subr.mxu1 %v172_v19 }
  0x38   :  { %340 = vmatprep.subr.mxu0 %v70_v16  ;;  %372 = vmatpush3.msra.mxu1 %v172_v19 }
  0x39   :  { %341 = vmatpush3.msra.mxu0 %v70_v16  ;;  %373 = vmatprep.subr.mxu1 %v171_v21 }
  0x3a   :  { %342 = vmatprep.subr.mxu0 %v69_v18  ;;  %374 = vmatpush3.msra.mxu1 %v171_v21 }
  0x3b   :  { %343 = vmatpush3.msra.mxu0 %v69_v18  ;;  %375 = vmatprep.subr.mxu1 %v170_v23 }
  0x3c   :  { %344 = vmatprep.subr.mxu0 %v68_v20  ;;  %376 = vmatpush3.msra.mxu1 %v170_v23 }
  0x3d   :  { %345 = vmatpush3.msra.mxu0 %v68_v20  ;;  %377 = vmatprep.subr.mxu1 %v169_v25 }
  0x3e   :  { %346 = vmatprep.subr.mxu0 %v67_v22  ;;  %378 = vmatpush3.msra.mxu1 %v169_v25 }
  0x3f   :  { %347 = vmatpush3.msra.mxu0 %v67_v22  ;;  %379 = vmatprep.subr.mxu1 %v168_v27 }
  0x40   :  { %348 = vmatprep.subr.mxu0 %v66_v24  ;;  %380 = vmatpush3.msra.mxu1 %v168_v27 }
  0x41   :  { %349 = vmatpush3.msra.mxu0 %v66_v24  ;;  %381 = vmatprep.subr.mxu1 %v167_v30 }
  0x42   :  { %350 = vmatprep.subr.mxu0 %v65_v26  ;;  %382 = vmatpush3.msra.mxu1 %v167_v30 }
  0x43   :  { %351 = vmatpush3.msra.mxu0 %v65_v26  ;;  %383 = vmatprep.subr.mxu1 %v166_v31 }
  0x44   :  { %352 = vmatprep.subr.mxu0 %v64_v28  ;;  %384 = vmatpush3.msra.mxu1 %v166_v31 }
  0x45   :  { %353 = vmatpush3.msra.mxu0 %v64_v28  ;;  %385 = vmatprep.subr.mxu1 %v165_v32 }
  0x46   :  { %355 = vmatmul.mubr.f32.vlgmr.msra.gmra.mxu0 %v63_v29  ;;  %386 = vmatpush3.msra.mxu1 %v165_v32 }
  0x47   :  { %387 = vmatprep.subr.mxu1 %v164_v33 }
  0x48   :  { %388 = vmatpush3.msra.mxu1 %v164_v33 }
 0x106   :  { %v356_v35 = vpop.f32.mrf.mxu0 }
 0x107   :  { %v159_v36 = vadd.f32 %v356_v35, %v284_v34 }
 0x108   :  { %v153_v37 = vpop.f32.mrf.mxu0 }
 0x109   :  { %v154_v38 = vadd.f32 %v284_v34, %v153_v37  ;;  %v163_v40 = vmax.f32 %v159_v36, 0.0 }
 0x10b   :  { %v162_v39 = vmax.f32 %v154_v38, 0.0 }
 0x10d   :  { %389 = vmatprep.mubr.f32.mxu1 %v162_v39 }
 0x10e   :  { %390 = vmatmul.mubr.f32.vlgmr.msra.gmra.mxu1 %v163_v40 }
 0x1ce   :  { %v391_v42 = vpop.f32.mrf.mxu1 }
 0x1cf   :  { %v259_v43 = vadd.f32 %v391_v42, %v285_v41 }
 0x1d0   :  { %v253_v44 = vpop.f32.mrf.mxu1 }
 0x1d1   :  { %v263_v45 = vmax.f32 %v259_v43, 0.0  ;;  %v254_v46 = vadd.f32 %v285_v41, %v253_v44 }
 0x1d3   :  { %265 = vst [vmem:[#allocation8 + $0x8] sm:$0xff] %v263_v45  ;;  %v262_v47 = vmax.f32 %v254_v46, 0.0 }
 0x1d5   :  { %264 = vst [vmem:[#allocation8] sm:$0xff] %v262_v47 }
 0x1d6   :  { %469 = shalt.err (!%p466_p5)
}
 0x1d7   :  { %277 = dma.vmem_to_hbm [thread:$0]  %s272_s12, 256, %s555_s5, [#allocation4], %s486_s23, %s486_s23, %s487_s24  }
 0x1d8   :  { %482 = dma.done.wait [#allocation4], 256  }
 0x1d9   :  { %483 = vsyncadd [#allocation4], 4294967040 }
 0x1da   :  { %281 = vsyncpa [#allocation3], 1 }
 0x1db   :  { %282 = vsyncpa [#allocation6], 1 }
 0x1dc   :  { %283 = vsyncpa [#allocation4], 1 }

// kernel: tpu_custom_call.1
= control target key start
LH: loop header
LB: loop body
LE: loop exit
PB: predicated region body
PF: predicated region fallthrough
CT: control target
= control target key end

     0   :  { %10 = vsyncpa [#allocation3], 0  ;;  %s550_s0 = inlined_call_operand.hbm [shape: f32[16,128], index: 0, kind: input, shape index: {}]   ;;  %s551_s1 = inlined_call_operand.hbm [shape: f32[128,128], index: 1, kind: input, shape index: {}]   ;;  %s552_s2 = inlined_call_operand.vmem [shape: f32[1,128], index: 2, kind: input, shape index: {}]   ;;  %s553_s3 = inlined_call_operand.hbm [shape: f32[128,128], index: 3, kind: input, shape index: {}]   ;;  %s554_s4 = inlined_call_operand.vmem [shape: f32[1,128], index: 4, kind: input, shape index: {}]   ;;  %s555_s5 = inlined_call_operand.hbm [shape: f32[16,128], index: 5, kind: output, shape index: {}]  }
   0x1   :  { %11 = vsyncpa [#allocation6], 0 }
   0x2   :  { %12 = vsyncpa [#allocation4], 0  ;;  %s484_s18 = smov [#allocation5]   ;;  %s485_s20 = smov [#allocation2]  }
   0x3   :  { %s30_s19 = sshll.u32 %s484_s18, 4  ;;  %s18_s21 = sshll.u32 %s485_s20, 4  ;;  %s31_s19 = int_to_ptr.vmem [resolvable:$true] %s30_s19  ;;  %s19_s21 = int_to_ptr.vmem [resolvable:$true] %s18_s21 }
   0x4   :  { %s406_s22 = scalar_lea.vmem %s31_s19, 2048  ;;  %p411_p1 = scmp.lt.s32.totalorder %s31_s19, %s31_s19 }
   0x5   :  { %p407_p0 = scmp.ne.s32.totalorder %s31_s19, %s406_s22  ;;  %p412_p2 = scmp.lt.s32.totalorder %s406_s22, %s406_s22 }
   0x7   :  { %p413_p3 = por %p412_p2, %p411_p1 }
   0x9   :  { %p414_p4 = pnand %p413_p3, %p407_p0 }
   0xb   :  { %417 = shalt.err (!%p414_p4)
}
   0xc   :  { %s486_s23 = smov 128   ;;  %s487_s24 = smov 8  }
   0xd   :  { %36 = dma.hbm_to_vmem [thread:$0]  %s551_s1, 2048, %s31_s19, [#allocation6], %s486_s23, %s486_s23, %s487_s24  }
   0xe   :  { %s426_s27 = scalar_lea.vmem %s19_s21, 256  ;;  %p431_p6 = scmp.lt.s32.totalorder %s19_s21, %s19_s21 }
   0xf   :  { %p427_p5 = scmp.ne.s32.totalorder %s19_s21, %s426_s27  ;;  %p432_p7 = scmp.lt.s32.totalorder %s426_s27, %s426_s27 }
  0x11   :  { %p433_p8 = por %p432_p7, %p431_p6 }
  0x13   :  { %p434_p9 = pnand %p433_p8, %p427_p5 }
  0x15   :  { %437 = shalt.err (!%p434_p9)
}
  0x16   :  { %24 = dma.hbm_to_vmem [thread:$0]  %s550_s0, 256, %s19_s21, [#allocation3], %s486_s23, %s486_s23, %s487_s24  }
  0x17   :  { %s488_s30 = smov [#allocation7]  }
  0x18   :  { %s44_s6 = sshll.u32 %s488_s30, 4  ;;  %s45_s6 = int_to_ptr.vmem [resolvable:$true] %s44_s6 }
  0x19   :  { %s446_s7 = scalar_lea.vmem %s45_s6, 2048  ;;  %p451_p11 = scmp.lt.s32.totalorder %s45_s6, %s45_s6 }
  0x1a   :  { %p447_p10 = scmp.ne.s32.totalorder %s45_s6, %s446_s7  ;;  %p452_p12 = scmp.lt.s32.totalorder %s446_s7, %s446_s7 }
  0x1c   :  { %p453_p13 = por %p452_p12, %p451_p11 }
  0x1e   :  { %p454_p0 = pnand %p453_p13, %p447_p10 }
  0x20   :  { %457 = shalt.err (!%p454_p0)
}
  0x21   :  { %50 = dma.hbm_to_vmem [thread:$0]  %s553_s3, 2048, %s45_s6, [#allocation6], %s486_s23, %s486_s23, %s487_s24  }
  0x22   :  { %478 = dma.done.wait [#allocation3], 256  }
  0x23   :  { %479 = vsyncadd [#allocation3], 4294967040 }
  0x24   :  { %480 = dma.done.wait [#allocation6], 4096  }
  0x25   :  { %481 = vsyncadd [#allocation6], 4294963200  ;;  %v79_v0 = vld [vmem:[#allocation5 + $0x78] sm:$0xff]  ;;  %v78_v1 = vld [vmem:[#allocation5 + $0x70] sm:$0xff]  ;;  %s489_s11 = smov [#allocation8]  }
  0x26   :  { %322 = vmatprep.subr.mxu0 %v79_v0  ;;  %v77_v2 = vld [vmem:[#allocation5 + $0x68] sm:$0xff]  ;;  %v76_v3 = vld [vmem:[#allocation5 + $0x60] sm:$0xff]  ;;  %v62_v4 = vld [vmem:[#allocation2] sm:$0xff]  ;;  %s271_s12 = sshll.u32 %s489_s11, 4  ;;  %s272_s12 = int_to_ptr.vmem [resolvable:$true] %s271_s12 }
  0x27   :  { %323 = vmatpush3.msra.mxu0 %v79_v0  ;;  %v75_v5 = vld [vmem:[#allocation5 + $0x58] sm:$0xff]  ;;  %354 = vmatprep.mubr.f32.mxu0 %v62_v4  ;;  %v178_v7 = vld [vmem:[#allocation7 + $0x70] sm:$0xff]  ;;  %v177_v9 = vld [vmem:[#allocation7 + $0x68] sm:$0xff]  ;;  %p463_p2 = scmp.lt.s32.totalorder %s272_s12, %s272_s12 }
  0x28   :  { %324 = vmatprep.subr.mxu0 %v78_v1  ;;  %v179_v6 = vld [vmem:[#allocation7 + $0x78] sm:$0xff]  ;;  %v74_v8 = vld [vmem:[#allocation5 + $0x50] sm:$0xff]  ;;  %v73_v10 = vld [vmem:[#allocation5 + $0x48] sm:$0xff] }
  0x29   :  { %325 = vmatpush3.msra.mxu0 %v78_v1  ;;  %357 = vmatprep.subr.mxu1 %v179_v6  ;;  %v176_v11 = vld [vmem:[#allocation7 + $0x60] sm:$0xff]  ;;  %v175_v13 = vld [vmem:[#allocation7 + $0x58] sm:$0xff]  ;;  %v174_v15 = vld [vmem:[#allocation7 + $0x50] sm:$0xff] }
  0x2a   :  { %326 = vmatprep.subr.mxu0 %v77_v2  ;;  %358 = vmatpush3.msra.mxu1 %v179_v6  ;;  %v72_v12 = vld [vmem:[#allocation5 + $0x40] sm:$0xff]  ;;  %v71_v14 = vld [vmem:[#allocation5 + $0x38] sm:$0xff]  ;;  %v70_v16 = vld [vmem:[#allocation5 + $0x30] sm:$0xff] }
  0x2b   :  { %327 = vmatpush3.msra.mxu0 %v77_v2  ;;  %359 = vmatprep.subr.mxu1 %v178_v7  ;;  %v173_v17 = vld [vmem:[#allocation7 + $0x48] sm:$0xff]  ;;  %v172_v19 = vld [vmem:[#allocation7 + $0x40] sm:$0xff]  ;;  %v171_v21 = vld [vmem:[#allocation7 + $0x38] sm:$0xff] }
  0x2c   :  { %328 = vmatprep.subr.mxu0 %v76_v3  ;;  %360 = vmatpush3.msra.mxu1 %v178_v7  ;;  %v69_v18 = vld [vmem:[#allocation5 + $0x28] sm:$0xff]  ;;  %v68_v20 = vld [vmem:[#allocation5 + $0x20] sm:$0xff]  ;;  %v67_v22 = vld [vmem:[#allocation5 + $0x18] sm:$0xff] }
  0x2d   :  { %329 = vmatpush3.msra.mxu0 %v76_v3  ;;  %361 = vmatprep.subr.mxu1 %v177_v9  ;;  %v170_v23 = vld [vmem:[#allocation7 + $0x30] sm:$0xff]  ;;  %v169_v25 = vld [vmem:[#allocation7 + $0x28] sm:$0xff]  ;;  %v168_v27 = vld [vmem:[#allocation7 + $0x20] sm:$0xff] }
  0x2e   :  { %330 = vmatprep.subr.mxu0 %v75_v5  ;;  %362 = vmatpush3.msra.mxu1 %v177_v9  ;;  %v66_v24 = vld [vmem:[#allocation5 + $0x10] sm:$0xff]  ;;  %v65_v26 = vld [vmem:[#allocation5 + $0x8] sm:$0xff]  ;;  %v64_v28 = vld [vmem:[#allocation5] sm:$0xff] }
  0x2f   :  { %331 = vmatpush3.msra.mxu0 %v75_v5  ;;  %363 = vmatprep.subr.mxu1 %v176_v11  ;;  %v63_v29 = vld [vmem:[#allocation2 + $0x8] sm:$0xff]  ;;  %v166_v31 = vld [vmem:[#allocation7 + $0x10] sm:$0xff]  ;;  %v165_v32 = vld [vmem:[#allocation7 + $0x8] sm:$0xff] }
  0x30   :  { %332 = vmatprep.subr.mxu0 %v74_v8  ;;  %364 = vmatpush3.msra.mxu1 %v176_v11  ;;  %v167_v30 = vld [vmem:[#allocation7 + $0x18] sm:$0xff]  ;;  %v164_v33 = vld [vmem:[#allocation7] sm:$0xff]  ;;  %v284_v34 = vld [vmem:[%s552_s2] ss:$0 sm:$0xff]  ;;  %s458_s2 = scalar_lea.vmem %s272_s12, 256 }
  0x31   :  { %333 = vmatpush3.msra.mxu0 %v74_v8  ;;  %365 = vmatprep.subr.mxu1 %v175_v13  ;;  %v285_v41 = vld [vmem:[%s554_s4] ss:$0 sm:$0xff]  ;;  %p459_p1 = scmp.ne.s32.totalorder %s272_s12, %s458_s2  ;;  %p464_p3 = scmp.lt.s32.totalorder %s458_s2, %s458_s2 }
  0x32   :  { %334 = vmatprep.subr.mxu0 %v73_v10  ;;  %366 = vmatpush3.msra.mxu1 %v175_v13 }
  0x33   :  { %335 = vmatpush3.msra.mxu0 %v73_v10  ;;  %367 = vmatprep.subr.mxu1 %v174_v15  ;;  %p465_p4 = por %p464_p3, %p463_p2 }
  0x34   :  { %336 = vmatprep.subr.mxu0 %v72_v12  ;;  %368 = vmatpush3.msra.mxu1 %v174_v15 }
  0x35   :  { %337 = vmatpush3.msra.mxu0 %v72_v12  ;;  %369 = vmatprep.subr.mxu1 %v173_v17  ;;  %p466_p5 = pnand %p465_p4, %p459_p1 }
  0x36   :  { %338 = vmatprep.subr.mxu0 %v71_v14  ;;  %370 = vmatpush3.msra.mxu1 %v173_v17 }
  0x37   :  { %339 = vmatpush3.msra.mxu0 %v71_v14  ;;  %371 = vmatprep.subr.mxu1 %v172_v19 }
  0x38   :  { %340 = vmatprep.subr.mxu0 %v70_v16  ;;  %372 = vmatpush3.msra.mxu1 %v172_v19 }
  0x39   :  { %341 = vmatpush3.msra.mxu0 %v70_v16  ;;  %373 = vmatprep.subr.mxu1 %v171_v21 }
  0x3a   :  { %342 = vmatprep.subr.mxu0 %v69_v18  ;;  %374 = vmatpush3.msra.mxu1 %v171_v21 }
  0x3b   :  { %343 = vmatpush3.msra.mxu0 %v69_v18  ;;  %375 = vmatprep.subr.mxu1 %v170_v23 }
  0x3c   :  { %344 = vmatprep.subr.mxu0 %v68_v20  ;;  %376 = vmatpush3.msra.mxu1 %v170_v23 }
  0x3d   :  { %345 = vmatpush3.msra.mxu0 %v68_v20  ;;  %377 = vmatprep.subr.mxu1 %v169_v25 }
  0x3e   :  { %346 = vmatprep.subr.mxu0 %v67_v22  ;;  %378 = vmatpush3.msra.mxu1 %v169_v25 }
  0x3f   :  { %347 = vmatpush3.msra.mxu0 %v67_v22  ;;  %379 = vmatprep.subr.mxu1 %v168_v27 }
  0x40   :  { %348 = vmatprep.subr.mxu0 %v66_v24  ;;  %380 = vmatpush3.msra.mxu1 %v168_v27 }
  0x41   :  { %349 = vmatpush3.msra.mxu0 %v66_v24  ;;  %381 = vmatprep.subr.mxu1 %v167_v30 }
  0x42   :  { %350 = vmatprep.subr.mxu0 %v65_v26  ;;  %382 = vmatpush3.msra.mxu1 %v167_v30 }
  0x43   :  { %351 = vmatpush3.msra.mxu0 %v65_v26  ;;  %383 = vmatprep.subr.mxu1 %v166_v31 }
  0x44   :  { %352 = vmatprep.subr.mxu0 %v64_v28  ;;  %384 = vmatpush3.msra.mxu1 %v166_v31 }
  0x45   :  { %353 = vmatpush3.msra.mxu0 %v64_v28  ;;  %385 = vmatprep.subr.mxu1 %v165_v32 }
  0x46   :  { %355 = vmatmul.mubr.f32.vlgmr.msra.gmra.mxu0 %v63_v29  ;;  %386 = vmatpush3.msra.mxu1 %v165_v32 }
  0x47   :  { %387 = vmatprep.subr.mxu1 %v164_v33 }
  0x48   :  { %388 = vmatpush3.msra.mxu1 %v164_v33 }
 0x106   :  { %v356_v35 = vpop.f32.mrf.mxu0 }
 0x107   :  { %v159_v36 = vadd.f32 %v356_v35, %v284_v34 }
 0x108   :  { %v153_v37 = vpop.f32.mrf.mxu0 }
 0x109   :  { %v154_v38 = vadd.f32 %v284_v34, %v153_v37  ;;  %v163_v40 = vmax.f32 %v159_v36, 0.0 }
 0x10b   :  { %v162_v39 = vmax.f32 %v154_v38, 0.0 }
 0x10d   :  { %389 = vmatprep.mubr.f32.mxu1 %v162_v39 }
 0x10e   :  { %390 = vmatmul.mubr.f32.vlgmr.msra.gmra.mxu1 %v163_v40 }
 0x1ce   :  { %v391_v42 = vpop.f32.mrf.mxu1 }
 0x1cf   :  { %v259_v43 = vadd.f32 %v391_v42, %v285_v41 }
 0x1d0   :  { %v253_v44 = vpop.f32.mrf.mxu1 }
 0x1d1   :  { %v263_v45 = vmax.f32 %v259_v43, 0.0  ;;  %v254_v46 = vadd.f32 %v285_v41, %v253_v44 }
 0x1d3   :  { %265 = vst [vmem:[#allocation8 + $0x8] sm:$0xff] %v263_v45  ;;  %v262_v47 = vmax.f32 %v254_v46, 0.0 }
 0x1d5   :  { %264 = vst [vmem:[#allocation8] sm:$0xff] %v262_v47 }
 0x1d6   :  { %469 = shalt.err (!%p466_p5)
}
 0x1d7   :  { %277 = dma.vmem_to_hbm [thread:$0]  %s272_s12, 256, %s555_s5, [#allocation4], %s486_s23, %s486_s23, %s487_s24  }
 0x1d8   :  { %482 = dma.done.wait [#allocation4], 256  }
 0x1d9   :  { %483 = vsyncadd [#allocation4], 4294967040 }
 0x1da   :  { %281 = vsyncpa [#allocation3], 1 }
 0x1db   :  { %282 = vsyncpa [#allocation6], 1 }
 0x1dc   :  { %283 = vsyncpa [#allocation4], 1 }

</bundles_post_ra>
